<compile_context>
chip_gen: v7x
topology: tpu7x:2x2x1
jax: 0.10.0
libtpu: 0.0.40
codegen_flags: <defaults>
</compile_context>

<pallas_src>
import functools

import jax
import jax.numpy as jnp
from jax.experimental import pallas as pl
from jax.experimental.pallas import tpu as pltpu


# ---------------------------------------------------------------------------
# Helpers
# ---------------------------------------------------------------------------
def _round_up(x: int, m: int) -> int:
    return ((x + m - 1) // m) * m


def _bilinear_weights(in_size: int, out_size: int,
                      out_pad: int, dtype=jnp.bfloat16) -> jnp.ndarray:
    """(out_pad, in_size) bilinear interpolation matrix (rows >= out_size are 0).

    Built with broadcasted comparisons (pure VPU work) instead of scatter-add.
    """
    scale = in_size / out_size
    src = (jnp.arange(out_size, dtype=jnp.float32) + 0.5) * scale - 0.5
    lo = jnp.floor(src)
    frac = src - lo
    lo_i = jnp.clip(lo.astype(jnp.int32), 0, in_size - 1)
    hi_i = jnp.clip(lo.astype(jnp.int32) + 1, 0, in_size - 1)
    cols = jnp.arange(in_size, dtype=jnp.int32)[None, :]            # (1, in)
    w = ((cols == lo_i[:, None]).astype(jnp.float32) * (1.0 - frac)[:, None]
         + (cols == hi_i[:, None]).astype(jnp.float32) * frac[:, None])
    if out_pad > out_size:
        w = jnp.concatenate(
            [w, jnp.zeros((out_pad - out_size, in_size), jnp.float32)], axis=0)
    return w.astype(dtype)


def _pick_batch(nc: int, in_bytes: int, out_bytes: int,
                budget_bytes: int = 32 << 20, cap: int = 32) -> int:
    """Channels per grid step: fit double-buffered tiles in a conservative
    VMEM budget, prefer an even grid length (>=2) so v7x's 2 TCs both work."""
    per_chan = 2 * (in_bytes + out_bytes)                 # double-buffered in+out
    max_b = int(max(1, min(cap, budget_bytes // max(per_chan, 1), nc)))
    best = 1
    for b in range(1, max_b + 1):
        if nc % b == 0:
            best = b
    for b in range(max_b, 0, -1):
        if nc % b == 0 and (nc // b) % 2 == 0:
            return b
    return best


# ---------------------------------------------------------------------------
# Pallas kernel
# ---------------------------------------------------------------------------
def _resize_kernel(img_ref, wy_ref, wxT_ref, out_ref):
    # img_ref : (B, H_in, W_in)      wy_ref  : (H_out_p, H_in)   bf16
    # wxT_ref : (W_in, W_out_p) bf16 out_ref : (B, H_out_p, W_out_p)
    b, h_in, w_in = img_ref.shape
    w_out_p = wxT_ref.shape[1]

    img = img_ref[...].astype(jnp.bfloat16)

    # W pass: one big lane-dense matmul, M = B*H_in.
    tmp = jnp.dot(img.reshape(b * h_in, w_in), wxT_ref[...],
                  preferred_element_type=jnp.float32)            # (B*H_in, W_out_p)
    tmp = tmp.astype(jnp.bfloat16).reshape(b, h_in, w_out_p)

    wy = wy_ref[...]
    is_int = jnp.issubdtype(out_ref.dtype, jnp.integer)
    for i in range(b):                                           # static unroll
        res = jnp.dot(wy, tmp[i], preferred_element_type=jnp.float32)
        if is_int:
            info = jnp.iinfo(out_ref.dtype)
            res = jnp.clip(jnp.round(res), info.min, info.max)
        out_ref[i] = res.astype(out_ref.dtype)


# ---------------------------------------------------------------------------
# Wrappers
# ---------------------------------------------------------------------------
@functools.partial(jax.jit, static_argnames=("size",))
def resize_image(img: jnp.ndarray, size) -> jnp.ndarray:
    """Bilinear-resize an NCHW image to `size = (h, w)` via a Pallas kernel."""
    h_out, w_out = size
    n, c, h_in, w_in = img.shape
    nc = n * c

    # Lane/sublane-dense padded output extents (sliced off afterwards).
    h_out_p = _round_up(h_out, 8)
    w_out_p = _round_up(w_out, 128)

    itemsize = jnp.dtype(img.dtype).itemsize
    bsz = _pick_batch(nc,
                      in_bytes=h_in * w_in * itemsize,
                      out_bytes=h_out_p * w_out_p * itemsize)
    grid = (nc // bsz,)

    wy = _bilinear_weights(h_in, h_out, h_out_p)            # (H_out_p, H_in) bf16
    wxT = _bilinear_weights(w_in, w_out, w_out_p).T         # (W_in, W_out_p) bf16

    img_flat = img.reshape(nc, h_in, w_in)

    out_flat = pl.pallas_call(
        _resize_kernel,
        out_shape=jax.ShapeDtypeStruct((nc, h_out_p, w_out_p), img.dtype),
        grid=grid,
        in_specs=[
            pl.BlockSpec((bsz, h_in, w_in), lambda i: (i, 0, 0)),
            pl.BlockSpec((h_out_p, h_in), lambda i: (0, 0)),
            pl.BlockSpec((w_in, w_out_p), lambda i: (0, 0)),
        ],
        out_specs=pl.BlockSpec((bsz, h_out_p, w_out_p), lambda i: (i, 0, 0)),
        compiler_params=pltpu.CompilerParams(
            dimension_semantics=("parallel",),
            vmem_limit_bytes=48 * 1024 * 1024,
        ),
    )(img_flat, wy, wxT)

    out = out_flat[:, :h_out, :w_out]
    return out.reshape(n, c, h_out, w_out)


@functools.partial(jax.jit, static_argnames=("ow", "oh", "w", "h"))
def resize_annots_bboxes(bboxes: jnp.ndarray, ow: int, oh: int, w: int, h: int) -> jnp.ndarray:
    """bboxes: (K, 4) COCO-style [x, y, bw, bh]; returns int32 scaled boxes.

    Plain jnp: a (K,4) elementwise op does not justify a pallas_call.
    jnp.round matches Python's round-half-to-even semantics of int(round(x)).
    """
    sw = w / ow
    sh = h / oh
    scale = jnp.array([sw, sh, sw, sh], dtype=jnp.float32)
    return jnp.round(bboxes.astype(jnp.float32) * scale).astype(jnp.int32)


class ResizePallas:
    """Pallas port of the torch `Resize` transform (bilinear)."""

    def __init__(self, size):
        if isinstance(size, int):
            size = (size, size)
        self.size = tuple(size)  # (h, w)

    def __call__(self, img: jnp.ndarray, bboxes: jnp.ndarray):
        h, w = self.size
        _, _, oh, ow = img.shape  # original height/width (PIL's img.size == (ow, oh))
        resized = resize_image(img, (h, w))
        new_boxes = resize_annots_bboxes(bboxes, ow=ow, oh=oh, w=w, h=h)
        return resized, new_boxes


# ---------------------------------------------------------------------------
# Demo
# ---------------------------------------------------------------------------
if __name__ == "__main__":
    key = jax.random.PRNGKey(0)
    k_img, k_box = jax.random.split(key)

    # small NCHW image and a few COCO-style bboxes
    img = jax.random.uniform(k_img, (2, 4, 16, 16), dtype=jnp.float32)
    bboxes = jax.random.uniform(k_box, (8, 4), dtype=jnp.float32, minval=0.0, maxval=16.0)

    resize = ResizePallas(size=(24, 20))  # (h, w)
    out_img, out_boxes = resize(img, bboxes)

    jax.block_until_ready(out_img)
    jax.block_until_ready(out_boxes)

    assert out_img.shape == (2, 4, 24, 20)
    assert out_img.dtype == img.dtype
    assert out_boxes.shape == (8, 4)
    assert out_boxes.dtype == jnp.int32

    print("KERNEL_OK")
</pallas_src>

<mosaic_0001>
module attributes {stable_mosaic.version = 11 : i64} {
  func.func @_resize_kernel(%arg0: i32, %arg1: memref<4x16x16xf32, #tpu.memory_space<vmem>>, %arg2: memref<24x16xbf16, #tpu.memory_space<vmem>>, %arg3: memref<16x128xbf16, #tpu.memory_space<vmem>>, %arg4: memref<4x24x128xf32, #tpu.memory_space<vmem>>) attributes {dimension_semantics = [#tpu.dimension_semantics<parallel>], iteration_bounds = array<i64: 2>, scalar_prefetch = 0 : i64, scratch_operands = 0 : i64, tpu.core_type = #tpu.core_type<tc>, window_params = [{transform_indices = @transform_0, window_bounds = array<i64: 4, 16, 16>}, {pipeline_mode = #tpu.pipeline_mode<synchronous>, transform_indices = @transform_1, window_bounds = array<i64: 24, 16>}, {pipeline_mode = #tpu.pipeline_mode<synchronous>, transform_indices = @transform_2, window_bounds = array<i64: 16, 128>}, {transform_indices = @transform_3, window_bounds = array<i64: 4, 24, 128>}]} {
    %c0 = arith.constant 0 : index
    %c0_0 = arith.constant 0 : index
    %c0_1 = arith.constant 0 : index
    %0 = vector.load %arg1[%c0, %c0_0, %c0_1] : memref<4x16x16xf32, #tpu.memory_space<vmem>>, vector<4x16x16xf32>
    %1 = arith.truncf %0 : vector<4x16x16xf32> to vector<4x16x16xbf16>
    %2 = vector.shape_cast %1 : vector<4x16x16xbf16> to vector<64x16xbf16>
    %c0_2 = arith.constant 0 : index
    %c0_3 = arith.constant 0 : index
    %3 = vector.load %arg3[%c0_2, %c0_3] : memref<16x128xbf16, #tpu.memory_space<vmem>>, vector<16x128xbf16>
    %cst = arith.constant dense<0.000000e+00> : vector<64x128xf32>
    %4 = tpu.matmul %2, %3, %cst {dimension_numbers = #tpu.dot_dimension_numbers<[1], [0], [0], [1], [0, 0, 1, 1], [], []>} : vector<64x16xbf16>, vector<16x128xbf16>, vector<64x128xf32> -> vector<64x128xf32>
    %5 = arith.truncf %4 : vector<64x128xf32> to vector<64x128xbf16>
    %6 = vector.shape_cast %5 : vector<64x128xbf16> to vector<4x16x128xbf16>
    %c0_4 = arith.constant 0 : index
    %c0_5 = arith.constant 0 : index
    %7 = vector.load %arg2[%c0_4, %c0_5] : memref<24x16xbf16, #tpu.memory_space<vmem>>, vector<24x16xbf16>
    %8 = vector.extract_strided_slice %6 {offsets = [0, 0, 0], sizes = [1, 16, 128], strides = [1, 1, 1]} : vector<4x16x128xbf16> to vector<1x16x128xbf16>
    %9 = vector.shape_cast %8 : vector<1x16x128xbf16> to vector<16x128xbf16>
    %cst_6 = arith.constant dense<0.000000e+00> : vector<24x128xf32>
    %10 = tpu.matmul %7, %9, %cst_6 {dimension_numbers = #tpu.dot_dimension_numbers<[1], [0], [0], [1], [0, 0, 1, 1], [], []>} : vector<24x16xbf16>, vector<16x128xbf16>, vector<24x128xf32> -> vector<24x128xf32>
    %c0_7 = arith.constant 0 : index
    %c0_8 = arith.constant 0 : index
    %c0_9 = arith.constant 0 : index
    %11 = vector.load %arg4[%c0_7, %c0_8, %c0_9] : memref<4x24x128xf32, #tpu.memory_space<vmem>>, vector<1x24x128xf32>
    %12 = vector.shape_cast %11 : vector<1x24x128xf32> to vector<24x128xf32>
    %13 = vector.shape_cast %10 : vector<24x128xf32> to vector<1x24x128xf32>
    tpu.vector_store %arg4[%c0_7, %c0_8, %c0_9], %13 {strides = array<i32>} : memref<4x24x128xf32, #tpu.memory_space<vmem>>, vector<1x24x128xf32>,
    %14 = vector.extract_strided_slice %6 {offsets = [1, 0, 0], sizes = [1, 16, 128], strides = [1, 1, 1]} : vector<4x16x128xbf16> to vector<1x16x128xbf16>
    %15 = vector.shape_cast %14 : vector<1x16x128xbf16> to vector<16x128xbf16>
    %cst_10 = arith.constant dense<0.000000e+00> : vector<24x128xf32>
    %16 = tpu.matmul %7, %15, %cst_10 {dimension_numbers = #tpu.dot_dimension_numbers<[1], [0], [0], [1], [0, 0, 1, 1], [], []>} : vector<24x16xbf16>, vector<16x128xbf16>, vector<24x128xf32> -> vector<24x128xf32>
    %c1 = arith.constant 1 : index
    %c0_11 = arith.constant 0 : index
    %c0_12 = arith.constant 0 : index
    %17 = vector.load %arg4[%c1, %c0_11, %c0_12] : memref<4x24x128xf32, #tpu.memory_space<vmem>>, vector<1x24x128xf32>
    %18 = vector.shape_cast %17 : vector<1x24x128xf32> to vector<24x128xf32>
    %19 = vector.shape_cast %16 : vector<24x128xf32> to vector<1x24x128xf32>
    tpu.vector_store %arg4[%c1, %c0_11, %c0_12], %19 {strides = array<i32>} : memref<4x24x128xf32, #tpu.memory_space<vmem>>, vector<1x24x128xf32>,
    %20 = vector.extract_strided_slice %6 {offsets = [2, 0, 0], sizes = [1, 16, 128], strides = [1, 1, 1]} : vector<4x16x128xbf16> to vector<1x16x128xbf16>
    %21 = vector.shape_cast %20 : vector<1x16x128xbf16> to vector<16x128xbf16>
    %cst_13 = arith.constant dense<0.000000e+00> : vector<24x128xf32>
    %22 = tpu.matmul %7, %21, %cst_13 {dimension_numbers = #tpu.dot_dimension_numbers<[1], [0], [0], [1], [0, 0, 1, 1], [], []>} : vector<24x16xbf16>, vector<16x128xbf16>, vector<24x128xf32> -> vector<24x128xf32>
    %c2 = arith.constant 2 : index
    %c0_14 = arith.constant 0 : index
    %c0_15 = arith.constant 0 : index
    %23 = vector.load %arg4[%c2, %c0_14, %c0_15] : memref<4x24x128xf32, #tpu.memory_space<vmem>>, vector<1x24x128xf32>
    %24 = vector.shape_cast %23 : vector<1x24x128xf32> to vector<24x128xf32>
    %25 = vector.shape_cast %22 : vector<24x128xf32> to vector<1x24x128xf32>
    tpu.vector_store %arg4[%c2, %c0_14, %c0_15], %25 {strides = array<i32>} : memref<4x24x128xf32, #tpu.memory_space<vmem>>, vector<1x24x128xf32>,
    %26 = vector.extract_strided_slice %6 {offsets = [3, 0, 0], sizes = [1, 16, 128], strides = [1, 1, 1]} : vector<4x16x128xbf16> to vector<1x16x128xbf16>
    %27 = vector.shape_cast %26 : vector<1x16x128xbf16> to vector<16x128xbf16>
    %cst_16 = arith.constant dense<0.000000e+00> : vector<24x128xf32>
    %28 = tpu.matmul %7, %27, %cst_16 {dimension_numbers = #tpu.dot_dimension_numbers<[1], [0], [0], [1], [0, 0, 1, 1], [], []>} : vector<24x16xbf16>, vector<16x128xbf16>, vector<24x128xf32> -> vector<24x128xf32>
    %c3 = arith.constant 3 : index
    %c0_17 = arith.constant 0 : index
    %c0_18 = arith.constant 0 : index
    %29 = vector.load %arg4[%c3, %c0_17, %c0_18] : memref<4x24x128xf32, #tpu.memory_space<vmem>>, vector<1x24x128xf32>
    %30 = vector.shape_cast %29 : vector<1x24x128xf32> to vector<24x128xf32>
    %31 = vector.shape_cast %28 : vector<24x128xf32> to vector<1x24x128xf32>
    tpu.vector_store %arg4[%c3, %c0_17, %c0_18], %31 {strides = array<i32>} : memref<4x24x128xf32, #tpu.memory_space<vmem>>, vector<1x24x128xf32>,
    return
  }
  func.func @transform_0(%arg0: i32) -> (i32, i32, i32) {
    %c0_i32 = arith.constant 0 : i32
    %c0_i32_0 = arith.constant 0 : i32
    %c0_i32_1 = arith.constant 0 : i32
    return %arg0, %c0_i32, %c0_i32_0 : i32, i32, i32
  }
  func.func @transform_1(%arg0: i32) -> (i32, i32) {
    %c0_i32 = arith.constant 0 : i32
    %c0_i32_0 = arith.constant 0 : i32
    %c0_i32_1 = arith.constant 0 : i32
    return %c0_i32, %c0_i32_0 : i32, i32
  }
  func.func @transform_2(%arg0: i32) -> (i32, i32) {
    %c0_i32 = arith.constant 0 : i32
    %c0_i32_0 = arith.constant 0 : i32
    %c0_i32_1 = arith.constant 0 : i32
    return %c0_i32, %c0_i32_0 : i32, i32
  }
  func.func @transform_3(%arg0: i32) -> (i32, i32, i32) {
    %c0_i32 = arith.constant 0 : i32
    %c0_i32_0 = arith.constant 0 : i32
    %c0_i32_1 = arith.constant 0 : i32
    return %arg0, %c0_i32, %c0_i32_0 : i32, i32, i32
  }
}

</mosaic_0001>

<bundles_post_ra>
// kernel: resize_image.1
= control target key start
LH: loop header
LB: loop body
LE: loop exit
PB: predicated region body
PF: predicated region fallthrough
CT: control target
= control target key end

     0   :  { %8 = vsyncpa [#allocation3], 0  ;;  %s945_s0 = inlined_call_operand.hbm [shape: f32[8,16,16], index: 0, kind: input, shape index: {}]   ;;  %s946_s1 = inlined_call_operand.vmem [shape: bf16[24,16], index: 1, kind: input, shape index: {}]   ;;  %s947_s2 = inlined_call_operand.vmem [shape: bf16[16,128], index: 2, kind: input, shape index: {}]   ;;  %s948_s3 = inlined_call_operand.vmem [shape: f32[8,24,128], index: 3, kind: output, shape index: {}]  }
   0x1   :  { %10 = vsyncpa [#allocation3 + $0x1], 0  ;;  %s817_s12 = smov 0   ;;  %s819_s13 = smov 0  }
   0x2   :  { %s821_s14 = smov 0   ;;  %s823_s15 = smov 0  }
   0x3 LB: > { %s592_s16 = sadd.s32 4294967295, %s792_s15   ;;  %s837_s17 = sadd.s32 1, %s792_s15   ;;  %s792_s15 = sphi %s823_s15, %s955_s15   ;;  %s788_s14 = sphi %s821_s14, %s954_s14   ;;  %s784_s13 = sphi %s819_s13, %s953_s13   ;;  %s780_s12 = sphi %s817_s12, %s952_s12  }
   0x4   : > { %s20_s18 = ssub.s32 %s792_s15, %s837_s17  ;;  %s23_s19 = sadd.s32 1, %s788_s14 }
   0x5   : > { %p21_p0 = scmp.eq.s32.totalorder %s20_s18, 0  ;;  %p30_p1 = scmp.ne.s32.totalorder %s788_s14, %s784_s13 }
   0x6   : > { %p31_p2 = scmp.eq.s32.totalorder %s792_s15, 0  ;;  %p36_p3 = scmp.ne.s32.totalorder %s784_s13, %s780_s12 }
   0x7   : > { %s847_s20 = scalar_select %p21_p0, %s788_s14, %s23_s19  }
   0x8   : > { %p32_p4 = por %p31_p2, %p30_p1  ;;  %p37_p5 = scmp.eq.s32.totalorder %s592_s16, 0 }
   0x9   : > { %p690_p6 = scmp.lt.s32.totalorder %s792_s15, 2  ;;  %s134_s22 = sand.u32 1, %s788_s14  }
   0xa   : > { %p852_p7 = por %p37_p5, %p36_p3  ;;  %s596_s23 = sshll.u32 %s134_s22, 6 }
   0xb   : > { %s631_s24 = sshll.u32 %s792_s15, 10  ;;  %s138_s28 = scalar_lea.vmem [#allocation2], %s596_s23 }
   0xc   : > { %s861_s27 = scalar_lea.hbm %s945_s0, %s631_s24  ;;  %s146_s29 = sshll.u32 %s138_s28, 4  ;;  %s863_s29 = int_to_ptr.vmem [resolvable:$true] %s146_s29 }
   0xd   : > { %p865_p8 = pnand %p690_p6, %p32_p4  ;;  %s870_s4 = scalar_lea.sflag [#allocation3], %s134_s22 }
   0xe   : > { %s728_s5 = scalar_lea.hbm %s861_s27, 1024  ;;  %s733_s8 = scalar_lea.hbm %s945_s0, 2048 }
   0xf   : > { %p729_p10 = scmp.ne.s32.totalorder %s861_s27, %s728_s5  ;;  %p730_p11 = pneg %p865_p8 }
  0x10   : > { %p734_p0 = scmp.lt.u32.totalorder %s861_s27, %s945_s0  ;;  %p735_p1 = scmp.lt.u32.totalorder %s733_s8, %s728_s5 }
  0x11   : > { %p731_p12 = pnand %p730_p11, %p729_p10  ;;  %p737_p3 = scmp.lt.u32.totalorder %s728_s5, %s861_s27 }
  0x12   : > { %p736_p2 = por %p735_p1, %p734_p0 }
  0x13   : > { %p732_p13 = pneg %p731_p12 }
  0x14   : > { %p738_p4 = por %p737_p3, %p736_p2 }
  0x16   : > { %p739_p5 = pnand %p738_p4, %p732_p13 }
  0x18   : > { %742 = shalt.err (!%p739_p5)
}
  0x19   : > { %s743_s11 = scalar_lea.vmem %s863_s29, 1024  ;;  %s794_s12 = smov [#allocation2]  }
  0x1a   : > { %p744_p6 = scmp.ne.s32.totalorder %s863_s29, %s743_s11  ;;  %s748_s18 = sshll.u32 %s794_s12, 4  ;;  %s749_s18 = int_to_ptr.vmem [resolvable:$false] %s748_s18 }
  0x1b   : > { %s750_s19 = scalar_lea.vmem %s749_s18, 2048  ;;  %p751_p9 = scmp.lt.s32.totalorder %s863_s29, %s749_s18 }
  0x1c   : > { %p746_p10 = pnand %p744_p6, %p730_p11  ;;  %p752_p0 = scmp.lt.s32.totalorder %s750_s19, %s743_s11 }
  0x1e   : > { %p747_p12 = pneg %p746_p10  ;;  %p753_p1 = por %p752_p0, %p751_p9 }
  0x20   : > { %p754_p2 = pnand %p753_p1, %p747_p12 }
  0x22   : > { %757 = shalt.err (!%p754_p2)
}
  0x23   : > { %s795_s22 = smov 128   ;;  %s796_s23 = smov 8  }
  0x24   : > { %689 = dma.hbm_to_vmem [thread:$0]  (!%p865_p8), %s861_s27, 1024, %s863_s29, %s870_s4, %s795_s22, %s795_s22, %s796_s23  }
  0x25   : > { %p154_p11 = scmp.lt.s32.totalorder %s792_s15, 3  ;;  %p951_p13 = scmp.ge.s32.totalorder %s792_s15, 1 }
  0x27   : > { %p155_p3 = pnand %p951_p13, %p154_p11 }
  0x28   : > { %s160_s24 = sand.u32 (!%p155_p3), 1, %s784_s13  }
  0x29   : > { %158 = sbr.rel (%p155_p3) target bundleno = 507 (0x1fb), region = 32  ;;  %s601_s25 = sshll.u32 (!%p155_p3), %s160_s24, 6 }
  0x2a   : > { %s161_s26 = scalar_lea.sflag (!%p155_p3), [#allocation3], %s160_s24  ;;  %s164_s28 = scalar_lea.vmem (!%p155_p3), [#allocation2], %s601_s25 }
  0x30   : > { %775 = dma.done.wait (%p852_p7), %s161_s26, 1024  }
  0x31   : > { %777 = vsyncadd (%p852_p7), %s161_s26, 4294966272  ;;  %v725_v0 = vld [vmem:[%s947_s2] sm:$0xff]   ;;  %v198_v2 = vld [vmem:[%s164_s28 + $0x8] sm:$0xff]  ;;  %vm217_vm0 = vcmask 130048   ;;  %s602_s4 = sshll.u32 %s592_s16, 2 }
  0x32   : > { %v197_v1 = vld [vmem:[%s164_s28] sm:$0xff]  ;;  %v199_v3 = vld [vmem:[%s164_s28 + $0x10] sm:$0xff]  ;;  %649 = vmatprep.subr.bf16.mxu0 %v725_v0  ;;  %v200_v5 = vld [vmem:[%s164_s28 + $0x18] sm:$0xff]  ;;  %p190_p7 = scmp.lt.s32.totalorder %s602_s4, 7 }
  0x33   : > { %v205_v4 = vpack.c.bf16 %v198_v2, %v197_v1  ;;  %v201_v6 = vld [vmem:[%s164_s28 + $0x20] sm:$0xff]  ;;  %v202_v7 = vld [vmem:[%s164_s28 + $0x28] sm:$0xff]  ;;  %650 = vmatpush3.bf16.msra.mxu0 %v725_v0  ;;  %v206_v8 = vpack.c.bf16 %v200_v5, %v199_v3  ;;  %v203_v10 = vld [vmem:[%s164_s28 + $0x30] sm:$0xff] }
  0x34   : > { %v207_v9 = vpack.c.bf16 %v202_v7, %v201_v6  ;;  %v204_v11 = vld [vmem:[%s164_s28 + $0x38] sm:$0xff]  ;;  %v726_v13 = vld [vmem:[%s946_s1] sm:$0xff]   ;;  %v727_v20 = vld [vmem:[%s946_s1 + $0x8] ss:$0 sps:$4 sm:$0xff]   ;;  %s957_s4 = smov (!%p190_p7, %s602_s4), 7 }
  0x35   : > { %651 = vmatprep.mubr.msk.bf16.mxu0 %vm217_vm0, %v205_v4  ;;  %v208_v12 = vpack.c.bf16 %v204_v11, %v203_v10  ;;  %661 = vmatprep.mubr.msk.bf16.mxu1 %vm217_vm0, %v726_v13  ;;  %s683_s7 = smul.u32 24, %s957_s4 }
  0x36   : > { %652 = vmatmul.mubr.msk.bf16.vlgmr.msra.gmra.mrb[0].mxu0 %vm217_vm0, %v206_v8 }
  0x37   : > { %655 = vmatprep.mubr.msk.bf16.mxu0 %vm217_vm0, %v207_v9  ;;  %s194_s10 = scalar_lea.vmem %s948_s3, %s683_s7 }
  0x3e   : > { %656 = vmatmul.mubr.msk.bf16.gmra.mrb[4].mxu0 %vm217_vm0, %v208_v12 }
  0x3f   : > { %673 = vmatprep.mubr.msk.bf16.mxu0 %vm217_vm0, %v726_v13 }
 0x109   : > { %v653_v14 = vpop.f32.mrb[0].mxu0 }
 0x10a   : > { %v264_v15 = vpop.f32.mrb[1].mxu0 }
 0x10b   : > { %v654_v16 = vpop.f32.mrb[2].mxu0 }
 0x10c   : > { %v296_v17 = vpack.c.bf16 %v654_v16, %v653_v14  ;;  %v267_v18 = vpop.f32.mrb[3].mxu0 }
 0x10d   : > { %v295_v19 = vpack.c.bf16 %v267_v18, %v264_v15 }
 0x10f   : > { %659 = vmatprep.subr.bf16.mxu1 %v295_v19 }
 0x110   : > { %660 = vmatpush3.bf16.msra.mxu1 %v295_v19 }
 0x111   : > { %v657_v21 = vpop.f32.mrb[4].mxu0  ;;  %665 = vmatprep.subr.bf16.mxu1 %v296_v17 }
 0x112   : > { %v280_v22 = vpop.f32.mrb[5].mxu0 }
 0x113   : > { %v658_v23 = vpop.f32.mrb[6].mxu0  ;;  %662 = vmatmul.mubr.msk.bf16.vlgmr.msra.gmra.mrb[0].mxu1 %vm217_vm0, %v727_v20 }
 0x114   : > { %v298_v24 = vpack.c.bf16 %v658_v23, %v657_v21  ;;  %v283_v25 = vpop.f32.mrb[7].mxu0  ;;  %666 = vmatpush3.bf16.msra.mxu1 %v296_v17  ;;  %667 = vmatprep.mubr.msk.bf16.mxu1 %vm217_vm0, %v726_v13 }
 0x115   : > { %v297_v26 = vpack.c.bf16 %v283_v25, %v280_v22 }
 0x116   : > { %677 = vmatprep.subr.bf16.mxu1 %v298_v24 }
 0x117   : > { %671 = vmatprep.subr.bf16.mxu0 %v297_v26 }
 0x118   : > { %672 = vmatpush3.bf16.msra.mxu0 %v297_v26 }
 0x11b   : > { %668 = vmatmul.mubr.msk.bf16.vlgmr.msra.gmra.mrb[4].mxu1 %vm217_vm0, %v727_v20  ;;  %674 = vmatmul.mubr.msk.bf16.vlgmr.msra.gmra.mrb[8].mxu0 %vm217_vm0, %v727_v20 }
 0x11c   : > { %678 = vmatpush3.bf16.msra.mxu1 %v298_v24  ;;  %679 = vmatprep.mubr.msk.bf16.mxu1 %vm217_vm0, %v726_v13 }
 0x123   : > { %680 = vmatmul.mubr.msk.bf16.vlgmr.msra.gmra.mrb[8].mxu1 %vm217_vm0, %v727_v20 }
 0x1e6   : > { %v663_v27 = vpop.f32.mrb[0].mxu1 }
 0x1e7   : > { %366 = vst [vmem:[%s194_s10 + $0x10] sm:$0xff] %v663_v27  ;;  %v350_v28 = vpop.f32.mrb[1].mxu1 }
 0x1e8   : > { %364 = vst [vmem:[%s194_s10] sm:$0xff] %v350_v28  ;;  %v664_v29 = vpop.f32.mrb[2].mxu1 }
 0x1e9   : > { %v353_v30 = vpop.f32.mrb[3].mxu1 }
 0x1ea   : > { %365 = vst [vmem:[%s194_s10 + $0x8] sm:$0xff] %v353_v30 }
 0x1ee   : > { %v669_v31 = vpop.f32.mrb[4].mxu1  ;;  %v675_v32 = vpop.f32.mrb[8].mxu0 }
 0x1ef   : > { %617 = vst [vmem:[%s194_s10 + $0x28] sm:$0xff] %v669_v31  ;;  %v401_v33 = vpop.f32.mrb[5].mxu1  ;;  %v453_v34 = vpop.f32.mrb[9].mxu0  ;;  %622 = vst [vmem:[%s194_s10 + $0x40] sm:$0xff] %v675_v32 }
 0x1f0   : > { %615 = vst [vmem:[%s194_s10 + $0x18] sm:$0xff] %v401_v33  ;;  %v670_v35 = vpop.f32.mrb[6].mxu1  ;;  %v676_v36 = vpop.f32.mrb[10].mxu0  ;;  %620 = vst [vmem:[%s194_s10 + $0x30] sm:$0xff] %v453_v34 }
 0x1f1   : > { %v404_v37 = vpop.f32.mrb[7].mxu1  ;;  %v456_v38 = vpop.f32.mrb[11].mxu0 }
 0x1f2   : > { %616 = vst [vmem:[%s194_s10 + $0x20] sm:$0xff] %v404_v37  ;;  %621 = vst [vmem:[%s194_s10 + $0x38] sm:$0xff] %v456_v38 }
 0x1f6   : > { %v681_v39 = vpop.f32.mrb[8].mxu1 }
 0x1f7   : > { %627 = vst [vmem:[%s194_s10 + $0x58] sm:$0xff] %v681_v39  ;;  %v505_v40 = vpop.f32.mrb[9].mxu1 }
 0x1f8   : > { %625 = vst [vmem:[%s194_s10 + $0x48] sm:$0xff] %v505_v40  ;;  %v682_v41 = vpop.f32.mrb[10].mxu1 }
 0x1f9   : > { %v508_v42 = vpop.f32.mrb[11].mxu1 }
 0x1fa   : > { %626 = vst [vmem:[%s194_s10 + $0x50] sm:$0xff] %v508_v42 }
 0x1fb PF: > { %p13_p8 = scmp.ge.s32.totalorder %s837_s17, 4   ;;  %s952_s12 = smov %s784_s13 }
 0x1fc   : > { %s953_s13 = smov %s788_s14  ;;  %s954_s14 = smov %s847_s20 }
 0x1fd   : > { %s955_s15 = smov %s837_s17  ;;  %15 = sbr.rel (!%p13_p8) target bundleno = 3 (0x3), region = 75 }
 0x204   :  { %547 = vsyncpa [#allocation3], 1 }
 0x205   :  { %549 = vsyncpa [#allocation3 + $0x1], 1 }

</bundles_post_ra>
